<compile_context>
chip_gen: v6e
topology: v6e:2x2x1
jax: 0.10.0
libtpu: 0.0.40
codegen_flags: <defaults>
</compile_context>

<pallas_src>
import functools

import jax
import jax.numpy as jnp
from jax.experimental import pallas as pl
from jax.experimental.pallas import tpu as pltpu


# -----------------------------------------------------------------------------
# Pallas kernel: fused conv(im2col matmul) + ReLU + global-avg-pool + linear head
# for the WHOLE batch in a single grid step.
# -----------------------------------------------------------------------------
def _fused_forward_kernel(patches_ref, w1_ref, b1_ref, w2_ref, b2_ref, out_ref,
                          *, batch, positions):
    # patches_ref: (B*P, F)   bf16  im2col patches for the whole batch
    # w1_ref:      (F, Cout)  bf16  conv weight, PyTorch (Cout,Cin,K,K) flattened + T
    # b1_ref:      (1, Cout)  f32
    # w2_ref:      (Cout, 128) f32  classifier weight, pre-scaled by 1/P (folds the mean)
    # b2_ref:      (1, 128)   f32   classifier bias, zero-padded to 128 lanes
    # out_ref:     (B, 128)   f32   lane-dense logits slab
    # One MXU job for the convolution over the whole flattened batch.
    h = jnp.dot(patches_ref[...], w1_ref[...],
                preferred_element_type=jnp.float32)            # (B*P, Cout), f32 acc

    b1 = b1_ref[...]                                           # hoisted broadcast source
    pooled_rows = []
    for b in range(batch):
        # Bias + ReLU + column-sum per 256-row image segment (bounds live ranges).
        hb = jnp.maximum(h[b * positions:(b + 1) * positions, :] + b1, 0.0)
        pooled_rows.append(jnp.sum(hb, axis=0, keepdims=True))  # (1, Cout)
    pooled = jnp.concatenate(pooled_rows, axis=0)               # (B, Cout), sum (1/P folded into w2)

    # Batched classifier head: one (B, Cout) x (Cout, 128) matmul + bias.
    logits = jnp.dot(pooled, w2_ref[...],
                     preferred_element_type=jnp.float32) + b2_ref[...]
    out_ref[...] = logits.astype(out_ref.dtype)                 # single lane-dense store


def model_wrapper_forward(images, params):
    """images: (B, Cin, H, W) float32 NCHW (PyTorch convention). Returns (B, NC) logits."""
    conv_w, conv_b, fc_w, fc_b = params
    B, Cin, H, W = images.shape
    Cout, _, K, _ = conv_w.shape
    NC = fc_w.shape[0]
    P = H * W
    F = Cin * K * K
    NCp = 128                      # lane-dense logits slab width; sliced to NC outside
    pad = K // 2

    # Single fused XLA op for im2col.  Patch feature order is (c, ki, kj), which
    # matches PyTorch's conv weight .reshape(Cout, Cin*K*K) flattening.
    patches = jax.lax.conv_general_dilated_patches(
        images, filter_shape=(K, K), window_strides=(1, 1),
        padding=((pad, pad), (pad, pad)),
        dimension_numbers=("NCHW", "OIHW", "NHWC"),
    )                                                           # (B, H, W, F)
    patches = patches.reshape(B * P, F).astype(jnp.bfloat16)    # (B*P, F) bf16

    w1 = conv_w.reshape(Cout, F).T.astype(jnp.bfloat16)         # (F, Cout) bf16
    b1 = conv_b.reshape(1, Cout).astype(jnp.float32)            # (1, Cout)
    # Fold the global-average-pool 1/P into the classifier weight; zero-pad the
    # class dim to 128 lanes so the kernel writes one dense slab.
    w2 = jnp.zeros((Cout, NCp), jnp.float32).at[:, :NC].set(fc_w.T / float(P))
    b2 = jnp.zeros((1, NCp), jnp.float32).at[:, :NC].set(fc_b.reshape(1, NC))

    kernel = functools.partial(_fused_forward_kernel, batch=B, positions=P)
    out = pl.pallas_call(
        kernel,
        out_shape=jax.ShapeDtypeStruct((B, NCp), jnp.float32),
        grid_spec=pltpu.PrefetchScalarGridSpec(
            num_scalar_prefetch=0,
            grid=(1,),   # single step: whole problem fits trivially in VMEM
            in_specs=[
                pl.BlockSpec((B * P, F), lambda i: (0, 0)),
                pl.BlockSpec((F, Cout), lambda i: (0, 0)),
                pl.BlockSpec((1, Cout), lambda i: (0, 0)),
                pl.BlockSpec((Cout, NCp), lambda i: (0, 0)),
                pl.BlockSpec((1, NCp), lambda i: (0, 0)),
            ],
            out_specs=pl.BlockSpec((B, NCp), lambda i: (0, 0)),
        ),
        compiler_params=pltpu.CompilerParams(
            dimension_semantics=("arbitrary",),
        ),
    )(patches, w1, b1, w2, b2)
    return out[:, :NC]


def _reference_forward(images, params):
    """Pure-JAX f32 reference mirroring the PyTorch model, for correctness checking."""
    conv_w, conv_b, fc_w, fc_b = params
    y = jax.lax.conv_general_dilated(
        images, conv_w, window_strides=(1, 1), padding="SAME",
        dimension_numbers=("NCHW", "OIHW", "NCHW"),
    ) + conv_b.reshape(1, -1, 1, 1)
    y = jnp.maximum(y, 0.0)
    pooled = jnp.mean(y, axis=(2, 3))                # (B, Cout)
    return pooled @ fc_w.T + fc_b                    # (B, NC)


if __name__ == "__main__":
    # Small deterministic setup: batch=2, channels=4, spatial=16x16, hidden=32, classes=10.
    B, Cin, H, W = 2, 4, 16, 16
    Cout, K, NC = 32, 3, 10

    key = jax.random.PRNGKey(0)
    k_img, k_cw, k_cb, k_fw, k_fb = jax.random.split(key, 5)

    images = jax.random.normal(k_img, (B, Cin, H, W), dtype=jnp.float32)
    conv_w = 0.1 * jax.random.normal(k_cw, (Cout, Cin, K, K), dtype=jnp.float32)
    conv_b = 0.1 * jax.random.normal(k_cb, (Cout,), dtype=jnp.float32)
    fc_w = 0.1 * jax.random.normal(k_fw, (NC, Cout), dtype=jnp.float32)
    fc_b = 0.1 * jax.random.normal(k_fb, (NC,), dtype=jnp.float32)
    params = (conv_w, conv_b, fc_w, fc_b)

    logits = jax.jit(model_wrapper_forward)(images, params)
    logits = jax.block_until_ready(logits)

    ref = jax.block_until_ready(_reference_forward(images, params))
    assert logits.shape == (B, NC)
    # Tolerance reflects bf16 MXU inputs (conv patches/weights) with f32 accumulation.
    assert jnp.allclose(logits, ref, atol=2e-2, rtol=2e-2), (
        f"max abs err = {jnp.max(jnp.abs(logits - ref))}"
    )

    print("KERNEL_OK")
</pallas_src>

<mosaic_0001>
module attributes {stable_mosaic.version = 11 : i64} {
  func.func @_fused_forward_kernel(%arg0: i32, %arg1: memref<512x36xbf16, #tpu.memory_space<vmem>>, %arg2: memref<36x32xbf16, #tpu.memory_space<vmem>>, %arg3: memref<1x32xf32, #tpu.memory_space<vmem>>, %arg4: memref<32x128xf32, #tpu.memory_space<vmem>>, %arg5: memref<1x128xf32, #tpu.memory_space<vmem>>, %arg6: memref<2x128xf32, #tpu.memory_space<vmem>>) attributes {dimension_semantics = [#tpu.dimension_semantics<arbitrary>], iteration_bounds = array<i64: 1>, scalar_prefetch = 0 : i64, scratch_operands = 0 : i64, tpu.core_type = #tpu.core_type<tc>, window_params = [{pipeline_mode = #tpu.pipeline_mode<synchronous>, transform_indices = @transform_0, window_bounds = array<i64: 512, 36>}, {pipeline_mode = #tpu.pipeline_mode<synchronous>, transform_indices = @transform_1, window_bounds = array<i64: 36, 32>}, {pipeline_mode = #tpu.pipeline_mode<synchronous>, transform_indices = @transform_2, window_bounds = array<i64: 1, 32>}, {pipeline_mode = #tpu.pipeline_mode<synchronous>, transform_indices = @transform_3, window_bounds = array<i64: 32, 128>}, {pipeline_mode = #tpu.pipeline_mode<synchronous>, transform_indices = @transform_4, window_bounds = array<i64: 1, 128>}, {pipeline_mode = #tpu.pipeline_mode<synchronous>, transform_indices = @transform_5, window_bounds = array<i64: 2, 128>}]} {
    %c0 = arith.constant 0 : index
    %c0_0 = arith.constant 0 : index
    %0 = vector.load %arg1[%c0, %c0_0] : memref<512x36xbf16, #tpu.memory_space<vmem>>, vector<512x36xbf16>
    %c0_1 = arith.constant 0 : index
    %c0_2 = arith.constant 0 : index
    %1 = vector.load %arg2[%c0_1, %c0_2] : memref<36x32xbf16, #tpu.memory_space<vmem>>, vector<36x32xbf16>
    %cst = arith.constant dense<0.000000e+00> : vector<512x32xf32>
    %2 = tpu.matmul %0, %1, %cst {dimension_numbers = #tpu.dot_dimension_numbers<[1], [0], [0], [1], [0, 0, 1, 1], [], []>} : vector<512x36xbf16>, vector<36x32xbf16>, vector<512x32xf32> -> vector<512x32xf32>
    %c0_3 = arith.constant 0 : index
    %c0_4 = arith.constant 0 : index
    %3 = vector.load %arg3[%c0_3, %c0_4] : memref<1x32xf32, #tpu.memory_space<vmem>>, vector<1x32xf32>
    %4 = vector.extract_strided_slice %2 {offsets = [0, 0], sizes = [256, 32], strides = [1, 1]} : vector<512x32xf32> to vector<256x32xf32>
    %5 = vector.broadcast %3 : vector<1x32xf32> to vector<256x32xf32>
    %6 = arith.addf %4, %5 : vector<256x32xf32>
    %cst_5 = arith.constant 0.000000e+00 : f32
    %7 = vector.broadcast %cst_5 : f32 to vector<256x32xf32>
    %8 = arith.maximumf %6, %7 : vector<256x32xf32>
    %cst_6 = arith.constant dense<0.000000e+00> : vector<32xf32>
    %9 = vector.multi_reduction <add>, %8, %cst_6 [0] : vector<256x32xf32> to vector<32xf32>
    %10 = vector.shape_cast %9 : vector<32xf32> to vector<1x32xf32>
    %11 = vector.extract_strided_slice %2 {offsets = [256, 0], sizes = [256, 32], strides = [1, 1]} : vector<512x32xf32> to vector<256x32xf32>
    %12 = vector.broadcast %3 : vector<1x32xf32> to vector<256x32xf32>
    %13 = arith.addf %11, %12 : vector<256x32xf32>
    %cst_7 = arith.constant 0.000000e+00 : f32
    %14 = vector.broadcast %cst_7 : f32 to vector<256x32xf32>
    %15 = arith.maximumf %13, %14 : vector<256x32xf32>
    %cst_8 = arith.constant dense<0.000000e+00> : vector<32xf32>
    %16 = vector.multi_reduction <add>, %15, %cst_8 [0] : vector<256x32xf32> to vector<32xf32>
    %17 = vector.shape_cast %16 : vector<32xf32> to vector<1x32xf32>
    %18 = tpu.concatenate %10, %17 in 0 : vector<1x32xf32>, vector<1x32xf32> -> vector<2x32xf32>
    %c0_9 = arith.constant 0 : index
    %c0_10 = arith.constant 0 : index
    %19 = vector.load %arg4[%c0_9, %c0_10] : memref<32x128xf32, #tpu.memory_space<vmem>>, vector<32x128xf32>
    %cst_11 = arith.constant dense<0.000000e+00> : vector<2x128xf32>
    %20 = tpu.matmul %18, %19, %cst_11 {dimension_numbers = #tpu.dot_dimension_numbers<[1], [0], [0], [1], [0, 0, 1, 1], [], []>} : vector<2x32xf32>, vector<32x128xf32>, vector<2x128xf32> -> vector<2x128xf32>
    %c0_12 = arith.constant 0 : index
    %c0_13 = arith.constant 0 : index
    %21 = vector.load %arg5[%c0_12, %c0_13] : memref<1x128xf32, #tpu.memory_space<vmem>>, vector<1x128xf32>
    %22 = vector.broadcast %21 : vector<1x128xf32> to vector<2x128xf32>
    %23 = arith.addf %20, %22 : vector<2x128xf32>
    %c0_14 = arith.constant 0 : index
    %c0_15 = arith.constant 0 : index
    %24 = vector.load %arg6[%c0_14, %c0_15] : memref<2x128xf32, #tpu.memory_space<vmem>>, vector<2x128xf32>
    tpu.vector_store %arg6[%c0_14, %c0_15], %23 {strides = array<i32>} : memref<2x128xf32, #tpu.memory_space<vmem>>, vector<2x128xf32>,
    return
  }
  func.func @transform_0(%arg0: i32) -> (i32, i32) {
    %c0_i32 = arith.constant 0 : i32
    %c0_i32_0 = arith.constant 0 : i32
    %c0_i32_1 = arith.constant 0 : i32
    return %c0_i32, %c0_i32_0 : i32, i32
  }
  func.func @transform_1(%arg0: i32) -> (i32, i32) {
    %c0_i32 = arith.constant 0 : i32
    %c0_i32_0 = arith.constant 0 : i32
    %c0_i32_1 = arith.constant 0 : i32
    return %c0_i32, %c0_i32_0 : i32, i32
  }
  func.func @transform_2(%arg0: i32) -> (i32, i32) {
    %c0_i32 = arith.constant 0 : i32
    %c0_i32_0 = arith.constant 0 : i32
    %c0_i32_1 = arith.constant 0 : i32
    return %c0_i32, %c0_i32_0 : i32, i32
  }
  func.func @transform_3(%arg0: i32) -> (i32, i32) {
    %c0_i32 = arith.constant 0 : i32
    %c0_i32_0 = arith.constant 0 : i32
    %c0_i32_1 = arith.constant 0 : i32
    return %c0_i32, %c0_i32_0 : i32, i32
  }
  func.func @transform_4(%arg0: i32) -> (i32, i32) {
    %c0_i32 = arith.constant 0 : i32
    %c0_i32_0 = arith.constant 0 : i32
    %c0_i32_1 = arith.constant 0 : i32
    return %c0_i32, %c0_i32_0 : i32, i32
  }
  func.func @transform_5(%arg0: i32) -> (i32, i32) {
    %c0_i32 = arith.constant 0 : i32
    %c0_i32_0 = arith.constant 0 : i32
    %c0_i32_1 = arith.constant 0 : i32
    return %c0_i32, %c0_i32_0 : i32, i32
  }
}

</mosaic_0001>

<bundles_post_ra>
// kernel: model_wrapper_forward.1
= control target key start
LH: loop header
LB: loop body
LE: loop exit
PB: predicated region body
PF: predicated region fallthrough
CT: control target
= control target key end

     0   :  { %vm363_vm0 = vcmask 1041408   ;;  %vm266_vm1 = vcmask 293888   ;;  %s1664_s0 = inlined_call_operand.vmem [shape: bf16[512,36], index: 0, kind: input, shape index: {}]   ;;  %s1665_s1 = inlined_call_operand.vmem [shape: bf16[36,32], index: 1, kind: input, shape index: {}]   ;;  %s1666_s2 = inlined_call_operand.vmem [shape: f32[1,32], index: 2, kind: input, shape index: {}]   ;;  %s1667_s3 = inlined_call_operand.vmem [shape: f32[32,128], index: 3, kind: input, shape index: {}]   ;;  %s1668_s4 = inlined_call_operand.vmem [shape: f32[1,128], index: 4, kind: input, shape index: {}]   ;;  %s1669_s5 = inlined_call_operand.hbm [shape: f32[2,128], index: 5, kind: output, shape index: {}]  }
   0x1   :  { %v1233_v0 = vld [vmem:[%s1665_s1 + $0x10] ss:$0 sps:$4 sm:$0x33]   ;;  %v1234_v1 = vld [vmem:[%s1665_s1 + $0x8] sm:$0xff]   ;;  %v1236_v3 = vld [vmem:[%s1664_s0] sm:$0xff]  }
   0x2   :  { %1228 = vmatprep.subr.msk.bf16.mxu0 %vm363_vm0, %v1233_v0  ;;  %v365_v2 = vsel %vm363_vm0, %v1233_v0, 0  ;;  %1229 = vmatprep.subr.msk.bf16.mxu1 %vm363_vm0, %v1233_v0  ;;  %v1235_v4 = vld [vmem:[%s1665_s1] sm:$0xff]   ;;  %v1237_v5 = vld [vmem:[%s1664_s0 + $0x8] sm:$0xff]   ;;  %v1238_v6 = vld [vmem:[%s1664_s0 + $0x10] sm:$0xff]  }
   0x3   :  { %1142 = vmatpush3.bf16.msra.mxu0 %v365_v2  ;;  %1225 = vmatpush3.bf16.msra.mxu1 %v365_v2  ;;  %v1239_v7 = vld [vmem:[%s1664_s0 + $0x18] sm:$0xff]   ;;  %v1240_v8 = vld [vmem:[%s1664_s0 + $0x20] sm:$0xff]   ;;  %v1254_v9 = vld [vmem:[%s1664_s0 + $0x90] sm:$0xff]  }
   0x4   :  { %1143 = vmatprep.subr.bf16.mxu0 %v1234_v1  ;;  %1223 = vmatprep.subr.bf16.mxu1 %v1234_v1  ;;  %v1255_v10 = vld [vmem:[%s1664_s0 + $0x98] sm:$0xff]   ;;  %v1256_v11 = vld [vmem:[%s1664_s0 + $0xa0] sm:$0xff]   ;;  %v1241_v12 = vld [vmem:[%s1664_s0 + $0x28] sm:$0xff]  }
   0x5   :  { %1147 = vmatprep.mubr.msk.bf16.mxu0 %vm266_vm1, %v1236_v3  ;;  %1183 = vmatprep.mubr.msk.bf16.mxu1 %vm266_vm1, %v1254_v9  ;;  %v1242_v13 = vld [vmem:[%s1664_s0 + $0x30] sm:$0xff]   ;;  %v1257_v14 = vld [vmem:[%s1664_s0 + $0xa8] sm:$0xff]   ;;  %v1243_v16 = vld [vmem:[%s1664_s0 + $0x38] sm:$0xff]  }
   0x6   :  { %v1258_v15 = vld [vmem:[%s1664_s0 + $0xb0] sm:$0xff]   ;;  %v1244_v17 = vld [vmem:[%s1664_s0 + $0x40] sm:$0xff]  }
   0x7   :  { %1144 = vmatpush3.bf16.msra.mxu0 %v1234_v1  ;;  %1226 = vmatpush3.bf16.msra.mxu1 %v1234_v1 }
   0x8   :  { %1145 = vmatprep.subr.bf16.mxu0 %v1235_v4  ;;  %1224 = vmatprep.subr.bf16.mxu1 %v1235_v4 }
   0xb   :  { %1146 = vmatpush3.bf16.msra.mxu0 %v1235_v4  ;;  %1227 = vmatpush3.bf16.msra.mxu1 %v1235_v4 }
   0xe   :  { %1148 = vmatmul.mubr.msk.bf16.vlgmr.msra.gmra.mxu0 %vm266_vm1, %v1237_v5  ;;  %1184 = vmatmul.mubr.msk.bf16.vlgmr.msra.gmra.mxu1 %vm266_vm1, %v1255_v10 }
   0xf   :  { %1151 = vmatprep.mubr.msk.bf16.mxu0 %vm266_vm1, %v1238_v6  ;;  %1187 = vmatprep.mubr.msk.bf16.mxu1 %vm266_vm1, %v1256_v11 }
  0x16   :  { %1152 = vmatmul.mubr.msk.bf16.gmra.mxu0 %vm266_vm1, %v1239_v7  ;;  %1188 = vmatmul.mubr.msk.bf16.gmra.mxu1 %vm266_vm1, %v1257_v14 }
  0x17   :  { %1155 = vmatprep.mubr.msk.bf16.mxu0 %vm266_vm1, %v1240_v8  ;;  %1191 = vmatprep.mubr.msk.bf16.mxu1 %vm266_vm1, %v1258_v15 }
  0x1e   :  { %1156 = vmatmul.mubr.msk.bf16.gmra.mxu0 %vm266_vm1, %v1241_v12 }
  0x1f   :  { %1159 = vmatprep.mubr.msk.bf16.mxu0 %vm266_vm1, %v1242_v13 }
  0x20   :  { %10 = vsyncpa [#allocation3], 0  ;;  %v1259_v18 = vld [vmem:[%s1664_s0 + $0xb8] sm:$0xff]   ;;  %v1260_v19 = vld [vmem:[%s1664_s0 + $0xc0] sm:$0xff]   ;;  %v1290_v37 = vmov 0.0   ;;  %vm727_vm2 = vcmask 261120  }
  0x21   :  { %1192 = vmatmul.mubr.msk.bf16.gmra.mxu1 %vm266_vm1, %v1259_v18  ;;  %v1245_v20 = vld [vmem:[%s1664_s0 + $0x48] sm:$0xff]   ;;  %v1246_v21 = vld [vmem:[%s1664_s0 + $0x50] sm:$0xff]   ;;  %v1247_v24 = vld [vmem:[%s1664_s0 + $0x58] sm:$0xff]   ;;  %1211 = vmatprep.subr.mxu1 %v1290_v37  ;;  %vm1291_vm3 = vmmov 0   ;;  %vm930_vm4 = vcmask 1040384   ;;  %s1292_s19 = smov [#allocation2]  }
  0x22   :  { %1195 = vmatprep.mubr.msk.bf16.mxu1 %vm266_vm1, %v1260_v19  ;;  %v1261_v22 = vld [vmem:[%s1664_s0 + $0xc8] sm:$0xff]   ;;  %v1262_v23 = vld [vmem:[%s1664_s0 + $0xd0] sm:$0xff]   ;;  %v1248_v25 = vld [vmem:[%s1664_s0 + $0x60] sm:$0xff]   ;;  %s1023_s20 = sshll.u32 %s1292_s19, 4  ;;  %s1024_s20 = int_to_ptr.vmem [resolvable:$true] %s1023_s20 }
  0x23   :  { %v1263_v26 = vld [vmem:[%s1664_s0 + $0xd8] sm:$0xff]   ;;  %v1264_v27 = vld [vmem:[%s1664_s0 + $0xe0] sm:$0xff]   ;;  %v1249_v28 = vld [vmem:[%s1664_s0 + $0x68] sm:$0xff]   ;;  %s1268_s21 = scalar_lea.vmem %s1024_s20, 32  ;;  %p1273_p1 = scmp.lt.s32.totalorder %s1024_s20, %s1024_s20 }
  0x24   :  { %v1250_v29 = vld [vmem:[%s1664_s0 + $0x70] sm:$0xff]   ;;  %v1265_v30 = vld [vmem:[%s1664_s0 + $0xe8] sm:$0xff]   ;;  %v1251_v32 = vld [vmem:[%s1664_s0 + $0x78] sm:$0xff]   ;;  %p1269_p0 = scmp.ne.s32.totalorder %s1024_s20, %s1268_s21  ;;  %p1274_p2 = scmp.lt.s32.totalorder %s1268_s21, %s1268_s21 }
  0x25   :  { %v1266_v31 = vld [vmem:[%s1664_s0 + $0xf0] sm:$0xff]   ;;  %v1252_v33 = vld [vmem:[%s1664_s0 + $0x80] sm:$0xff]   ;;  %v1267_v34 = vld [vmem:[%s1664_s0 + $0xf8] sm:$0xff]  }
  0x26   :  { %1160 = vmatmul.mubr.msk.bf16.gmra.mxu0 %vm266_vm1, %v1243_v16  ;;  %v1253_v35 = vld [vmem:[%s1664_s0 + $0x88] sm:$0xff]   ;;  %v935_v36 = vld [vmem:[%s1667_s3 + $0x18] sm:$0xff]  ;;  %v934_v38 = vld [vmem:[%s1667_s3 + $0x10] sm:$0xff]  ;;  %p1275_p3 = por %p1274_p2, %p1273_p1 }
  0x27   :  { %1163 = vmatprep.mubr.msk.bf16.mxu0 %vm266_vm1, %v1244_v17  ;;  %1212 = vmatpush3.msra.mxu1 %v935_v36  ;;  %v1469_v40 = vld [vmem:[%s1666_s2] ss:$0 sm:$0xff]  ;;  %v933_v12 = vld [vmem:[%s1667_s3 + $0x8] sm:$0xff] }
  0x28   :  { %1213 = vmatprep.subr.mxu1 %v1290_v37  ;;  %v932_v13 = vld [vmem:[%s1667_s3] sm:$0xff]  ;;  %p1276_p4 = pnand %p1275_p3, %p1269_p0 }
  0x29   :  { %1196 = vmatmul.mubr.msk.bf16.gmra.mxu1 %vm266_vm1, %v1261_v22 }
  0x2a   :  { %1199 = vmatprep.mubr.msk.bf16.mxu1 %vm266_vm1, %v1262_v23  ;;  %1214 = vmatpush3.msra.mxu1 %v934_v38 }
  0x2b   :  { %1215 = vmatprep.subr.mxu1 %v1290_v37 }
  0x2c   :  { %1216 = vmatpush3.msra.mxu1 %v933_v12 }
  0x2d   :  { %1217 = vmatprep.subr.mxu1 %v1290_v37 }
  0x2e   :  { %1164 = vmatmul.mubr.msk.bf16.gmra.mxu0 %vm266_vm1, %v1245_v20  ;;  %1218 = vmatpush3.msra.mxu1 %v932_v13 }
  0x2f   :  { %1167 = vmatprep.mubr.msk.bf16.mxu0 %vm266_vm1, %v1246_v21 }
  0x31   :  { %1200 = vmatmul.mubr.msk.bf16.gmra.mxu1 %vm266_vm1, %v1263_v26 }
  0x32   :  { %1203 = vmatprep.mubr.msk.bf16.mxu1 %vm266_vm1, %v1264_v27 }
  0x36   :  { %1168 = vmatmul.mubr.msk.bf16.gmra.mxu0 %vm266_vm1, %v1247_v24 }
  0x37   :  { %1171 = vmatprep.mubr.msk.bf16.mxu0 %vm266_vm1, %v1248_v25 }
  0x39   :  { %1204 = vmatmul.mubr.msk.bf16.gmra.mxu1 %vm266_vm1, %v1265_v30 }
  0x3a   :  { %1207 = vmatprep.mubr.msk.bf16.mxu1 %vm266_vm1, %v1266_v31 }
  0x3e   :  { %1172 = vmatmul.mubr.msk.bf16.gmra.mxu0 %vm266_vm1, %v1249_v28 }
  0x3f   :  { %1175 = vmatprep.mubr.msk.bf16.mxu0 %vm266_vm1, %v1250_v29 }
  0x41   :  { %1208 = vmatmul.mubr.msk.bf16.gmra.mxu1 %vm266_vm1, %v1267_v34 }
  0x42   :  { %1219 = vmatprep.mubr.msk.f32.mxu1 %vm1291_vm3, %v1290_v37 }
  0x46   :  { %1176 = vmatmul.mubr.msk.bf16.gmra.mxu0 %vm266_vm1, %v1251_v32 }
  0x47   :  { %1179 = vmatprep.mubr.msk.bf16.mxu0 %vm266_vm1, %v1252_v33 }
  0x4e   :  { %1180 = vmatmul.mubr.msk.bf16.gmra.mxu0 %vm266_vm1, %v1253_v35 }
  0xce   :  { %v1149_v39 = vpop.f32.mrf.mxu0  ;;  %v1478_v59 = vpop.f32.mrf.mxu1 }
  0xcf   :  { %v665_v44 = vadd.f32 %v1149_v39, %v1469_v40 }
  0xd0   :  { %v401_v41 = vpop.f32.mrf.mxu0  ;;  %v1485_v6 = vpop.f32.mrf.mxu1 }
  0xd1   :  { %v663_v42 = vadd.f32 %v1469_v40, %v401_v41  ;;  %v697_v50 = vmax.f32 %v665_v44, 0.0 }
  0xd2   :  { %v1150_v43 = vpop.f32.mrf.mxu0  ;;  %v1496_v19 = vpop.f32.mrf.mxu1 }
  0xd3   :  { %v695_v46 = vmax.f32 %v663_v42, 0.0  ;;  %v666_v47 = vadd.f32 %v1150_v43, %v1469_v40  ;;  %v731_v60 = vsel %vm727_vm2, %v697_v50, 0.0 }
  0xd4   :  { %v404_v45 = vpop.f32.mrf.mxu0  ;;  %v1503_v30 = vpop.f32.mrf.mxu1 }
  0xd5   :  { %v664_v48 = vadd.f32 %v1469_v40, %v404_v45  ;;  %v728_v53 = vsel %vm727_vm2, %v695_v46, 0.0  ;;  %v698_v54 = vmax.f32 %v666_v47, 0.0 }
  0xd6   :  { %v1153_v49 = vpop.f32.mrf.mxu0  ;;  %v1508_v42 = vpop.f32.mrf.mxu1 }
  0xd7   :  { %v696_v51 = vmax.f32 %v664_v48, 0.0  ;;  %v669_v61 = vadd.f32 %v1153_v49, %v1469_v40  ;;  %v733_v1 = vsel %vm727_vm2, %v698_v54, 0.0 }
  0xd8   :  { %v417_v52 = vpop.f32.mrf.mxu0 }
  0xd9   :  { %v729_v55 = vsel %vm727_vm2, %v696_v51, 0.0  ;;  %v667_v56 = vadd.f32 %v1469_v40, %v417_v52  ;;  %v701_v7 = vmax.f32 %v669_v61, 0.0 }
  0xda   :  { %v730_v57 = vadd.f32 %v729_v55, %v728_v53  ;;  %v1154_v58 = vpop.f32.mrf.mxu0  ;;  %v1515_v53 = vpop.f32.mrf.mxu1 }
  0xdb   :  { %v699_v62 = vmax.f32 %v667_v56, 0.0  ;;  %v670_v2 = vadd.f32 %v1154_v58, %v1469_v40  ;;  %v739_v20 = vsel %vm727_vm2, %v701_v7, 0.0 }
  0xdc   :  { %v732_v63 = vadd.f32 %v731_v60, %v730_v57  ;;  %v420_v0 = vpop.f32.mrf.mxu0 }
  0xdd   :  { %v668_v3 = vadd.f32 %v1469_v40, %v420_v0  ;;  %v735_v8 = vsel %vm727_vm2, %v699_v62, 0.0  ;;  %v702_v14 = vmax.f32 %v670_v2, 0.0 }
  0xde   :  { %v734_v4 = vadd.f32 %v733_v1, %v732_v63  ;;  %v1157_v5 = vpop.f32.mrf.mxu0  ;;  %v1520_v1 = vpop.f32.mrf.mxu1 }
  0xdf   :  { %v700_v9 = vmax.f32 %v668_v3, 0.0  ;;  %v673_v21 = vadd.f32 %v1157_v5, %v1469_v40  ;;  %v741_v25 = vsel %vm727_vm2, %v702_v14, 0.0 }
  0xe0   :  { %v736_v10 = vadd.f32 %v735_v8, %v734_v4  ;;  %v433_v11 = vpop.f32.mrf.mxu0  ;;  %v1527_v13 = vpop.f32.mrf.mxu1 }
  0xe1   :  { %v737_v15 = vsel %vm727_vm2, %v700_v9, 0.0  ;;  %v671_v16 = vadd.f32 %v1469_v40, %v433_v11  ;;  %v705_v31 = vmax.f32 %v673_v21, 0.0 }
  0xe2   :  { %v738_v17 = vadd.f32 %v737_v15, %v736_v10  ;;  %v1158_v18 = vpop.f32.mrf.mxu0 }
  0xe3   :  { %v703_v22 = vmax.f32 %v671_v16, 0.0  ;;  %v674_v26 = vadd.f32 %v1158_v18, %v1469_v40  ;;  %v747_v43 = vsel %vm727_vm2, %v705_v31, 0.0 }
  0xe4   :  { %v740_v23 = vadd.f32 %v739_v20, %v738_v17  ;;  %v436_v24 = vpop.f32.mrf.mxu0 }
  0xe5   :  { %v672_v27 = vadd.f32 %v1469_v40, %v436_v24  ;;  %v743_v32 = vsel %vm727_vm2, %v703_v22, 0.0  ;;  %v706_v36 = vmax.f32 %v674_v26, 0.0 }
  0xe6   :  { %v742_v28 = vadd.f32 %v741_v25, %v740_v23  ;;  %v1161_v29 = vpop.f32.mrf.mxu0  ;;  %v1532_v25 = vpop.f32.mrf.mxu1 }
  0xe7   :  { %v704_v33 = vmax.f32 %v672_v27, 0.0  ;;  %v677_v44 = vadd.f32 %v1161_v29, %v1469_v40  ;;  %v749_v48 = vsel %vm727_vm2, %v706_v36, 0.0 }
  0xe8   :  { %v744_v34 = vadd.f32 %v743_v32, %v742_v28  ;;  %v449_v35 = vpop.f32.mrf.mxu0 }
  0xe9   :  { %v745_v37 = vsel %vm727_vm2, %v704_v33, 0.0  ;;  %v675_v38 = vadd.f32 %v1469_v40, %v449_v35  ;;  %v709_v54 = vmax.f32 %v677_v44, 0.0 }
  0xea   :  { %v746_v39 = vadd.f32 %v745_v37, %v744_v34  ;;  %v1162_v41 = vpop.f32.mrf.mxu0  ;;  %v1539_v37 = vpop.f32.mrf.mxu1 }
  0xeb   :  { %v707_v45 = vmax.f32 %v675_v38, 0.0  ;;  %v678_v49 = vadd.f32 %v1162_v41, %v1469_v40  ;;  %v755_v2 = vsel %vm727_vm2, %v709_v54, 0.0 }
  0xec   :  { %v748_v46 = vadd.f32 %v747_v43, %v746_v39  ;;  %v452_v47 = vpop.f32.mrf.mxu0 }
  0xed   :  { %v676_v50 = vadd.f32 %v1469_v40, %v452_v47  ;;  %v751_v55 = vsel %vm727_vm2, %v707_v45, 0.0  ;;  %v710_v60 = vmax.f32 %v678_v49, 0.0 }
  0xee   :  { %v750_v51 = vadd.f32 %v749_v48, %v748_v46  ;;  %v1165_v52 = vpop.f32.mrf.mxu0 }
  0xef   :  { %v708_v56 = vmax.f32 %v676_v50, 0.0  ;;  %v681_v3 = vadd.f32 %v1165_v52, %v1469_v40  ;;  %v757_v8 = vsel %vm727_vm2, %v710_v60, 0.0  ;;  %v1544_v50 = vpop.f32.mrf.mxu1 }
  0xf0   :  { %v752_v57 = vadd.f32 %v751_v55, %v750_v51  ;;  %v465_v58 = vpop.f32.mrf.mxu0 }
  0xf1   :  { %v753_v61 = vsel %vm727_vm2, %v708_v56, 0.0  ;;  %v679_v62 = vadd.f32 %v1469_v40, %v465_v58  ;;  %v713_v14 = vmax.f32 %v681_v3, 0.0 }
  0xf2   :  { %v754_v63 = vadd.f32 %v753_v61, %v752_v57  ;;  %v1166_v0 = vpop.f32.mrf.mxu0 }
  0xf3   :  { %v711_v4 = vmax.f32 %v679_v62, 0.0  ;;  %v682_v9 = vadd.f32 %v1166_v0, %v1469_v40  ;;  %v763_v26 = vsel %vm727_vm2, %v713_v14, 0.0 }
  0xf4   :  { %v756_v5 = vadd.f32 %v755_v2, %v754_v63  ;;  %v468_v7 = vpop.f32.mrf.mxu0  ;;  %v1551_v63 = vpop.f32.mrf.mxu1 }
  0xf5   :  { %v680_v10 = vadd.f32 %v1469_v40, %v468_v7  ;;  %v759_v15 = vsel %vm727_vm2, %v711_v4, 0.0  ;;  %v714_v20 = vmax.f32 %v682_v9, 0.0 }
  0xf6   :  { %v758_v11 = vadd.f32 %v757_v8, %v756_v5  ;;  %v1169_v12 = vpop.f32.mrf.mxu0 }
  0xf7   :  { %v712_v16 = vmax.f32 %v680_v10, 0.0  ;;  %v685_v27 = vadd.f32 %v1169_v12, %v1469_v40  ;;  %v765_v32 = vsel %vm727_vm2, %v714_v20, 0.0  ;;  %v1556_v12 = vpop.f32.mrf.mxu1 }
  0xf8   :  { %v760_v17 = vadd.f32 %v759_v15, %v758_v11  ;;  %v481_v18 = vpop.f32.mrf.mxu0 }
  0xf9   :  { %v761_v21 = vsel %vm727_vm2, %v712_v16, 0.0  ;;  %v683_v22 = vadd.f32 %v1469_v40, %v481_v18  ;;  %v717_v38 = vmax.f32 %v685_v27, 0.0 }
  0xfa   :  { %v762_v23 = vadd.f32 %v761_v21, %v760_v17  ;;  %v1170_v24 = vpop.f32.mrf.mxu0 }
  0xfb   :  { %v715_v28 = vmax.f32 %v683_v22, 0.0  ;;  %v686_v33 = vadd.f32 %v1170_v24, %v1469_v40  ;;  %v771_v51 = vsel %vm727_vm2, %v717_v38, 0.0 }
  0xfc   :  { %v764_v29 = vadd.f32 %v763_v26, %v762_v23  ;;  %v484_v31 = vpop.f32.mrf.mxu0  ;;  %v1563_v26 = vpop.f32.mrf.mxu1 }
  0xfd   :  { %v684_v34 = vadd.f32 %v1469_v40, %v484_v31  ;;  %v767_v39 = vsel %vm727_vm2, %v715_v28, 0.0  ;;  %v718_v45 = vmax.f32 %v686_v33, 0.0 }
  0xfe   :  { %v766_v35 = vadd.f32 %v765_v32, %v764_v29  ;;  %v1173_v36 = vpop.f32.mrf.mxu0 }
  0xff   :  { %v716_v41 = vmax.f32 %v684_v34, 0.0  ;;  %v689_v52 = vadd.f32 %v1173_v36, %v1469_v40  ;;  %v773_v57 = vsel %vm727_vm2, %v718_v45, 0.0 }
 0x100   :  { %v768_v43 = vadd.f32 %v767_v39, %v766_v35  ;;  %v497_v44 = vpop.f32.mrf.mxu0  ;;  %v1568_v39 = vpop.f32.mrf.mxu1 }
 0x101   :  { %v769_v46 = vsel %vm727_vm2, %v716_v41, 0.0  ;;  %v687_v47 = vadd.f32 %v1469_v40, %v497_v44  ;;  %v721_v0 = vmax.f32 %v689_v52, 0.0 }
 0x102   :  { %v770_v48 = vadd.f32 %v769_v46, %v768_v43  ;;  %v1174_v49 = vpop.f32.mrf.mxu0  ;;  %v596_v52 = vpop.f32.mrf.mxu1 }
 0x103   :  { %v719_v54 = vmax.f32 %v687_v47, 0.0  ;;  %v690_v58 = vadd.f32 %v1174_v49, %v1469_v40  ;;  %v779_v14 = vsel %vm727_vm2, %v721_v0, 0.0 }
 0x104   :  { %v772_v55 = vadd.f32 %v771_v51, %v770_v48  ;;  %v500_v56 = vpop.f32.mrf.mxu0  ;;  %v1583_v0 = vpop.f32.mrf.mxu1 }
 0x105   :  { %v688_v60 = vadd.f32 %v1469_v40, %v500_v56  ;;  %v775_v2 = vsel %vm727_vm2, %v719_v54, 0.0  ;;  %v722_v7 = vmax.f32 %v690_v58, 0.0 }
 0x106   :  { %v774_v61 = vadd.f32 %v773_v57, %v772_v55  ;;  %v1177_v62 = vpop.f32.mrf.mxu0  ;;  %v801_v55 = vadd.f32 %v1469_v40, %v1485_v6 }
 0x107   :  { %v720_v3 = vmax.f32 %v688_v60, 0.0  ;;  %v693_v15 = vadd.f32 %v1177_v62, %v1469_v40  ;;  %v781_v20 = vsel %vm727_vm2, %v722_v7, 0.0  ;;  %v804_v7 = vadd.f32 %v1496_v19, %v1469_v40 }
 0x108   :  { %v776_v4 = vadd.f32 %v775_v2, %v774_v61  ;;  %v513_v5 = vpop.f32.mrf.mxu0  ;;  %v802_v61 = vadd.f32 %v1469_v40, %v1503_v30 }
 0x109   :  { %v777_v8 = vsel %vm727_vm2, %v720_v3, 0.0  ;;  %v691_v9 = vadd.f32 %v1469_v40, %v513_v5  ;;  %v725_v27 = vmax.f32 %v693_v15, 0.0  ;;  %v803_v3 = vadd.f32 %v1478_v59, %v1469_v40 }
 0x10a   :  { %v778_v10 = vadd.f32 %v777_v8, %v776_v4  ;;  %v1178_v11 = vpop.f32.mrf.mxu0  ;;  %v833_v4 = vmax.f32 %v801_v55, 0.0  ;;  %v834_v8 = vmax.f32 %v802_v61, 0.0 }
 0x10b   :  { %v723_v16 = vmax.f32 %v691_v9, 0.0  ;;  %v694_v21 = vadd.f32 %v1178_v11, %v1469_v40  ;;  %v787_v41 = vsel %vm727_vm2, %v725_v27, 0.0  ;;  %v835_v11 = vmax.f32 %v803_v3, 0.0 }
 0x10c   :  { %v780_v17 = vadd.f32 %v779_v14, %v778_v10  ;;  %v516_v18 = vpop.f32.mrf.mxu0  ;;  %v609_v10 = vpop.f32.mrf.mxu1  ;;  %v868_v30 = vsel %vm727_vm2, %v833_v4, 0.0  ;;  %v805_v14 = vadd.f32 %v1469_v40, %v1515_v53  ;;  %v870_v59 = vsel %vm727_vm2, %v834_v8, 0.0 }
 0x10d   :  { %v692_v22 = vadd.f32 %v1469_v40, %v516_v18  ;;  %v783_v28 = vsel %vm727_vm2, %v723_v16, 0.0  ;;  %v726_v33 = vmax.f32 %v694_v21, 0.0  ;;  %v836_v16 = vmax.f32 %v804_v7, 0.0 }
 0x10e   :  { %v782_v23 = vadd.f32 %v781_v20, %v780_v17  ;;  %v1181_v24 = vpop.f32.mrf.mxu0  ;;  %v806_v17 = vadd.f32 %v1469_v40, %v1527_v13  ;;  %v1202_v20 = vpop.f32.mrf.mxu1  ;;  %v872_v19 = vsel %vm727_vm2, %v835_v11, 0.0  ;;  %v807_v21 = vadd.f32 %v1508_v42, %v1469_v40 }
 0x10f   :  { %v724_v29 = vmax.f32 %v692_v22, 0.0  ;;  %v799_v43 = vadd.f32 %v1181_v24, %v1469_v40  ;;  %v789_v46 = vsel %vm727_vm2, %v726_v33, 0.0  ;;  %v837_v22 = vmax.f32 %v805_v14, 0.0 }
 0x110   :  { %v784_v31 = vadd.f32 %v783_v28, %v782_v23  ;;  %v529_v32 = vpop.f32.mrf.mxu0  ;;  %v874_v24 = vsel %vm727_vm2, %v836_v16, 0.0  ;;  %v808_v53 = vadd.f32 %v1520_v1, %v1469_v40  ;;  %v838_v27 = vmax.f32 %v806_v17, 0.0 }
 0x111   :  { %v785_v34 = vsel %vm727_vm2, %v724_v29, 0.0  ;;  %v797_v35 = vadd.f32 %v1469_v40, %v529_v32  ;;  %v831_v54 = vmax.f32 %v799_v43, 0.0  ;;  %v612_v29 = vpop.f32.mrf.mxu1  ;;  %v876_v13 = vsel %vm727_vm2, %v837_v22, 0.0 }
 0x112   :  { %v786_v36 = vadd.f32 %v785_v34, %v784_v31  ;;  %v1182_v38 = vpop.f32.mrf.mxu0  ;;  %v839_v31 = vmax.f32 %v807_v21, 0.0  ;;  %v809_v32 = vadd.f32 %v1469_v40, %v1539_v37  ;;  %v840_v34 = vmax.f32 %v808_v53, 0.0 }
 0x113   :  { %v829_v47 = vmax.f32 %v797_v35, 0.0  ;;  %v800_v48 = vadd.f32 %v1182_v38, %v1469_v40  ;;  %v864_v2 = vsel %vm727_vm2, %v831_v54, 0.0  ;;  %v878_v42 = vsel %vm727_vm2, %v838_v27, 0.0  ;;  %v1205_v38 = vpop.f32.mrf.mxu1 }
 0x114   :  { %v788_v44 = vadd.f32 %v787_v41, %v786_v36  ;;  %v532_v45 = vpop.f32.mrf.mxu0  ;;  %v810_v35 = vadd.f32 %v1469_v40, %v1551_v63  ;;  %v880_v1 = vsel %vm727_vm2, %v839_v31, 0.0  ;;  %v811_v41 = vadd.f32 %v1532_v25, %v1469_v40 }
 0x115   :  { %v798_v49 = vadd.f32 %v1469_v40, %v532_v45  ;;  %v861_v57 = vsel %vm727_vm2, %v829_v47, 0.0  ;;  %v832_v58 = vmax.f32 %v800_v48, 0.0  ;;  %v841_v43 = vmax.f32 %v809_v32, 0.0  ;;  %v625_v48 = vpop.f32.mrf.mxu1 }
 0x116   :  { %v1575_v51 = vadd.f32 %v789_v46, %v788_v44  ;;  %v882_v45 = vsel %vm727_vm2, %v840_v34, 0.0  ;;  %v812_v37 = vadd.f32 %v1544_v50, %v1469_v40  ;;  %v842_v46 = vmax.f32 %v810_v35, 0.0 }
 0x117   :  { %v830_v56 = vmax.f32 %v798_v49, 0.0  ;;  %v866_v6 = vsel %vm727_vm2, %v832_v58, 0.0  ;;  %v843_v49 = vmax.f32 %v811_v41, 0.0  ;;  %v884_v63 = vsel %vm727_vm2, %v841_v43, 0.0 }
 0x118   :  { %v813_v54 = vadd.f32 %v1469_v40, %v1563_v26  ;;  %v886_v25 = vsel %vm727_vm2, %v842_v46, 0.0  ;;  %v815_v50 = vadd.f32 %v1556_v12, %v1469_v40  ;;  %v816_v26 = vadd.f32 %v1568_v39, %v1469_v40 }
 0x119   :  { %v862_v60 = vsel %vm727_vm2, %v830_v56, 0.0  ;;  %v844_v56 = vmax.f32 %v812_v37, 0.0  ;;  %v888_v61 = vsel %vm727_vm2, %v843_v49, 0.0  ;;  %v817_v8 = vadd.f32 %v1469_v40, %v609_v10 }
 0x11a   :  { %v863_v62 = vadd.f32 %v862_v60, %v861_v57  ;;  %v814_v57 = vadd.f32 %v1469_v40, %v596_v52  ;;  %v1206_v60 = vpop.f32.mrf.mxu1  ;;  %v847_v7 = vmax.f32 %v815_v50, 0.0  ;;  %v848_v11 = vmax.f32 %v816_v26, 0.0 }
 0x11b   :  { %v890_v3 = vsel %vm727_vm2, %v844_v56, 0.0  ;;  %v818_v12 = vadd.f32 %v1469_v40, %v612_v29  ;;  %v819_v39 = vadd.f32 %v1583_v0, %v1469_v40  ;;  %v821_v53 = vadd.f32 %v1469_v40, %v625_v48 }
 0x11c   :  { %v865_v5 = vadd.f32 %v864_v2, %v863_v62  ;;  %v845_v62 = vmax.f32 %v813_v54, 0.0  ;;  %v846_v4 = vmax.f32 %v814_v57, 0.0  ;;  %v896_v16 = vsel %vm727_vm2, %v847_v7, 0.0 }
 0x11d   :  { %v850_v10 = vmax.f32 %v818_v12, 0.0  ;;  %v824_v35 = vadd.f32 %v1206_v60, %v1469_v40 }
 0x11e   :  { %v867_v9 = vadd.f32 %v866_v6, %v865_v5  ;;  %v628_v6 = vpop.f32.mrf.mxu1  ;;  %v892_v52 = vsel %vm727_vm2, %v845_v62, 0.0 }
 0x11f   :  { %v902_v29 = vsel %vm727_vm2, %v850_v10, 0.0  ;;  %v822_v0 = vadd.f32 %v1469_v40, %v628_v6  ;;  %v856_v46 = vmax.f32 %v824_v35, 0.0 }
 0x120   :  { %v869_v15 = vadd.f32 %v868_v30, %v867_v9  ;;  %v894_v30 = vsel %vm727_vm2, %v846_v4, 0.0 }
 0x121   :  { %v914_v56 = vsel %vm727_vm2, %v856_v46, 0.0 }
 0x122   :  { %v871_v18 = vadd.f32 %v870_v59, %v869_v15  ;;  %v1209_v15 = vpop.f32.mrf.mxu1  ;;  %v849_v59 = vmax.f32 %v817_v8, 0.0 }
 0x124   :  { %v873_v23 = vadd.f32 %v872_v19, %v871_v18  ;;  %v898_v18 = vsel %vm727_vm2, %v848_v11, 0.0  ;;  %v820_v19 = vadd.f32 %v1202_v20, %v1469_v40  ;;  %v641_v22 = vpop.f32.mrf.mxu1  ;;  %v823_v20 = vadd.f32 %v1205_v38, %v1469_v40 }
 0x126   :  { %v875_v28 = vadd.f32 %v874_v24, %v873_v23  ;;  %v851_v23 = vmax.f32 %v819_v39, 0.0  ;;  %v900_v24 = vsel %vm727_vm2, %v849_v59, 0.0  ;;  %v855_v43 = vmax.f32 %v823_v20, 0.0 }
 0x128   :  { %v877_v33 = vadd.f32 %v876_v13, %v875_v28  ;;  %v852_v28 = vmax.f32 %v820_v19, 0.0  ;;  %v1210_v13 = vpop.f32.mrf.mxu1  ;;  %v904_v32 = vsel %vm727_vm2, %v851_v23, 0.0  ;;  %v912_v49 = vsel %vm727_vm2, %v855_v43, 0.0 }
 0x12a   :  { %v879_v36 = vadd.f32 %v878_v42, %v877_v33  ;;  %v853_v33 = vmax.f32 %v821_v53, 0.0  ;;  %v906_v42 = vsel %vm727_vm2, %v852_v28, 0.0  ;;  %v644_v41 = vpop.f32.mrf.mxu1 }
 0x12b   :  { %v826_v38 = vadd.f32 %v1469_v40, %v644_v41 }
 0x12c   :  { %v881_v44 = vadd.f32 %v880_v1, %v879_v36  ;;  %v854_v36 = vmax.f32 %v822_v0, 0.0 }
 0x12d   :  { %v858_v57 = vmax.f32 %v826_v38, 0.0 }
 0x12e   :  { %v883_v47 = vadd.f32 %v882_v45, %v881_v44  ;;  %v908_v44 = vsel %vm727_vm2, %v853_v33, 0.0  ;;  %v825_v45 = vadd.f32 %v1469_v40, %v641_v22 }
 0x130   :  { %v885_v55 = vadd.f32 %v884_v63, %v883_v47  ;;  %v910_v47 = vsel %vm727_vm2, %v854_v36, 0.0  ;;  %v827_v63 = vadd.f32 %v1209_v15, %v1469_v40  ;;  %v857_v54 = vmax.f32 %v825_v45, 0.0 }
 0x132   :  { %v887_v58 = vadd.f32 %v886_v25, %v885_v55  ;;  %v828_v25 = vadd.f32 %v1210_v13, %v1469_v40  ;;  %v916_v50 = vsel %vm727_vm2, %v857_v54, 0.0 }
 0x134   :  { %v889_v2 = vadd.f32 %v888_v61, %v887_v58  ;;  %v791_v58 = vrot.slane %v1575_v51, 4  ;;  %v859_v61 = vmax.f32 %v827_v63, 0.0 }
 0x136   :  { %v891_v5 = vadd.f32 %v890_v3, %v889_v2  ;;  %v860_v2 = vmax.f32 %v828_v25, 0.0  ;;  %v918_v3 = vsel %vm727_vm2, %v858_v57, 0.0  ;;  %v792_v26 = vadd.f32 %v791_v58, %v1575_v51  ;;  %v1099_v51 = vld [vmem:[%s1668_s4] ss:$0 sm:$0xff] }
 0x138   :  { %v893_v9 = vadd.f32 %v892_v52, %v891_v5  ;;  %v920_v5 = vsel %vm727_vm2, %v859_v61, 0.0  ;;  %v922_v7 = vsel %vm727_vm2, %v860_v2, 0.0  ;;  %v793_v40 = vrot.slane %v792_v26, 2 }
 0x13a   :  { %v895_v14 = vadd.f32 %v894_v30, %v893_v9  ;;  %v794_v9 = vadd.f32 %v793_v40, %v792_v26 }
 0x13c   :  { %v897_v17 = vadd.f32 %v896_v16, %v895_v14  ;;  %v795_v12 = vrot.slane %v794_v9, 1 }
 0x13e   :  { %v899_v21 = vadd.f32 %v898_v18, %v897_v17  ;;  %v796_v16 = vadd.f32 %v795_v12, %v794_v9 }
 0x140   :  { %v901_v27 = vadd.f32 %v900_v24, %v899_v21 }
 0x142   :  { %v903_v31 = vadd.f32 %v902_v29, %v901_v27 }
 0x144   :  { %v905_v34 = vadd.f32 %v904_v32, %v903_v31 }
 0x146   :  { %v907_v1 = vadd.f32 %v906_v42, %v905_v34 }
 0x148   :  { %v909_v37 = vadd.f32 %v908_v44, %v907_v1 }
 0x14a   :  { %v911_v48 = vadd.f32 %v910_v47, %v909_v37 }
 0x14c   :  { %v913_v55 = vadd.f32 %v912_v49, %v911_v48 }
 0x14e   :  { %v915_v60 = vadd.f32 %v914_v56, %v913_v55 }
 0x150   :  { %v917_v62 = vadd.f32 %v916_v50, %v915_v60 }
 0x152   :  { %v919_v4 = vadd.f32 %v918_v3, %v917_v62 }
 0x154   :  { %v921_v6 = vadd.f32 %v920_v5, %v919_v4 }
 0x156   :  { %v923_v52 = vadd.f32 %v922_v7, %v921_v6 }
 0x158   :  { %v924_v8 = vrot.slane %v923_v52, 4 }
 0x15a   :  { %v925_v11 = vadd.f32 %v924_v8, %v923_v52 }
 0x15c   :  { %v926_v30 = vrot.slane %v925_v11, 2 }
 0x15e   :  { %v927_v14 = vadd.f32 %v926_v30, %v925_v11 }
 0x160   :  { %v928_v15 = vrot.slane %v927_v14, 1 }
 0x162   :  { %v929_v39 = vadd.f32 %v928_v15, %v927_v14 }
 0x164   :  { %v931_v59 = vsel %vm930_vm4, %v796_v16, %v929_v39 }
 0x165   :  { %1220 = vmatmul.mubr.msk.f32.vlgmr.msra.gmra.mxu1 %vm727_vm2, %v931_v59 }
 0x225   :  { %v1012_v17 = vpop.f32.mrf.mxu1 }
 0x226   :  { %v1013_v18 = vadd.f32 %v1099_v51, %v1012_v17 }
 0x227   :  { %v1221_v19 = vpop.f32.mrf.mxu1 }
 0x228   :  { %1016 = vst [vmem:[#allocation2] sm:$0x3] %v1013_v18 }
 0x229   :  { %1279 = shalt.err (!%p1276_p4)
}
 0x22a   :  { %1026 = dma.vmem_to_hbm [thread:$0]  %s1024_s20, 32, %s1669_s5, [#allocation3]  }
 0x22b   :  { %1288 = dma.done.wait [#allocation3], 32  }
 0x22c   :  { %1289 = vsyncadd [#allocation3], 4294967264 }
 0x22d   :  { %1030 = vsyncpa [#allocation3], 1 }

</bundles_post_ra>
